<compile_context>
chip_gen: v6e
topology: v6e:2x2x1
jax: 0.10.0
libtpu: 0.0.40
codegen_flags: <defaults>
</compile_context>

<pallas_src>
import functools

import jax
import jax.numpy as jnp
from jax.experimental import pallas as pl
from jax.experimental.pallas import tpu as pltpu

NEG_SLOPE = 0.2        # GATv2Conv default negative_slope
C_PAD = 128            # hidden width padded to a full lane group
MASK_BIAS = -1e30      # additive softmax mask (bf16-representable)


def _round_up(v, m):
    return ((v + m - 1) // m) * m


def _vmem_budget():
    """Per-generation VMEM budget (what we tile against) and scoped limit."""
    try:
        cap = int(pltpu.get_tpu_info().vmem_capacity_bytes)
    except Exception:
        cap = 64 * 1024 * 1024          # conservative fallback (v7x per-TC)
    budget = int(cap * 0.65)            # ~42 MiB on v7x, ~83 MiB on v5e/v6e
    limit = int(cap * 0.75)             # scoped vmem limit handed to Mosaic
    return budget, limit


def _choose_tile(n, budget):
    """Target-node tile, counting every VMEM consumer:
         resident xl  (bf16, single-buffered)       : 256 * n_pad
         resident xlT (f32, >=8 sublanes)           :  32 * n_pad
         streamed e + bias (bf16, double-buffered)  :   8 * tile * n_pad
         in-kernel f32 temps (e, scores, h, p)      : ~16 * tile * n_pad
         xr / out tiles (f32, double-buffered)      : 2048 * tile
    """
    n16 = _round_up(max(n, 16), 16)
    resident = 288 * n16 + (1 << 20)          # + 1 MiB slack for misc scratch
    per_row = 24 * n16 + 2048
    tile = (budget - resident) // per_row
    tile = min(tile, 2048)
    if n16 >= 2048:
        tile = min(tile, n16 // 8)            # keep >= 8 grid steps when large
    tile = max(16, (tile // 16) * 16)         # bf16 native sublane tile is 16
    return min(tile, n16)


def _biggat_kernel(C, neg_slope,
                   we_ref, att_ref,                # SMEM scalars, shape (C,)
                   xl_ref, xlT_ref, xr_ref,        # VMEM
                   e_ref, bias_ref, bgat_ref,      # VMEM
                   out_ref):
    e = e_ref[...].astype(jnp.float32)             # [tile_i, n_pad] (streamed bf16)
    xr = xr_ref[...]                               # [tile_i, C_PAD] f32
    scores = bias_ref[...].astype(jnp.float32)     # additive mask bias (bf16 stream)

    # Short, fully unrolled channel loop: every vreg stays lane-dense along the
    # source-node axis; no [tile, N, C] intermediate is materialized.
    for c in range(C):
        we_c = we_ref[c]                           # scalar (SMEM)
        att_c = att_ref[c]                         # scalar (SMEM)
        h = xlT_ref[c:c + 1, :] + xr[:, c:c + 1] + e * we_c
        h = jnp.maximum(h, neg_slope * h)          # LeakyReLU(0.2), max-form
        scores = scores + att_c * h

    # masked softmax over incoming edges of each target node (lane reduction);
    # self-loops guarantee every real row has a zero-bias entry, and masked
    # entries (bias = -1e30) underflow to exactly 0 in the exp.
    m = jnp.max(scores, axis=-1, keepdims=True)
    p = jnp.exp(scores - m)
    denom = jnp.sum(p, axis=-1, keepdims=True)

    # aggregate source messages on the MXU (bf16 in, f32 accumulate), then
    # normalize after the matmul (C divides per row instead of N).
    agg = jnp.dot(p.astype(jnp.bfloat16), xl_ref[...],
                  preferred_element_type=jnp.float32)
    agg = agg * pl.reciprocal(denom, approx=True) + bgat_ref[...]
    out_ref[...] = jnp.maximum(agg, 0.0)           # ReLU, lane-dense [tile_i, C_PAD] store


def init_params(key, num_node_features, num_classes):
    if num_node_features != 1:
        C = int(round(num_node_features / 2))
    else:
        C = 2
    ks = jax.random.split(key, 9)

    def glorot(k, shape):
        lim = (6.0 / (shape[0] + shape[1])) ** 0.5
        return jax.random.uniform(k, shape, jnp.float32, -lim, lim)

    params = dict(
        wl=glorot(ks[0], (num_node_features, C)),              # lin_l weight
        bl=0.01 * jax.random.normal(ks[1], (1, C), jnp.float32),
        wr=glorot(ks[2], (num_node_features, C)),              # lin_r weight
        br=0.01 * jax.random.normal(ks[3], (1, C), jnp.float32),
        we=glorot(ks[4], (1, C)),                               # lin_edge (edge_dim=1, no bias)
        att=glorot(ks[5], (1, C)),                              # attention vector 'a'
        bgat=0.01 * jax.random.normal(ks[6], (1, C), jnp.float32),
        w1=glorot(ks[7], (C, num_classes)),                     # lin1 weight
        b1=0.01 * jax.random.normal(ks[8], (1, num_classes), jnp.float32),
    )
    return params, C


def biggat_forward(x, edge_index, edge_attr, batch, params, num_classes, num_graphs):
    N = x.shape[0]
    C = params['wl'].shape[1]
    x = x.astype(jnp.float32)

    src = edge_index[0]
    dst = edge_index[1]
    ea = edge_attr[:, 0].astype(jnp.float32)

    # add_self_loops(fill_value='mean'): self-loop attr = mean of incoming edge attrs
    sums = jnp.zeros((N,), jnp.float32).at[dst].add(ea)
    cnts = jnp.zeros((N,), jnp.float32).at[dst].add(1.0)
    loop_attr = jnp.where(cnts > 0, sums / jnp.maximum(cnts, 1.0), 0.0)
    loop_idx = jnp.arange(N)
    src_all = jnp.concatenate([src, loop_idx])
    dst_all = jnp.concatenate([dst, loop_idx])
    attr_all = jnp.concatenate([ea, loop_attr])

    budget, vmem_limit = _vmem_budget()
    tile_i = _choose_tile(N, budget)
    n_pad = _round_up(N, tile_i)

    # TODO(synk): dense adjacency built with .set() cannot represent duplicate
    # (multi-)edges between the same ordered node pair; PyG would sum them.
    # Single-scatter construction (no extra N^2 passes): bf16 edge values and a
    # bf16 additive mask bias (-1e30 everywhere except real edges/self-loops).
    e_dense = jnp.zeros((n_pad, n_pad), jnp.bfloat16).at[dst_all, src_all].set(
        attr_all.astype(jnp.bfloat16))
    bias = jnp.full((n_pad, n_pad), MASK_BIAS, jnp.bfloat16).at[dst_all, src_all].set(0.0)

    # hoisted GATv2 projections, hidden width zero-padded to 128 lanes
    def pad_c(w):
        return jnp.pad(w, ((0, 0), (0, C_PAD - C)))

    wl, bl = pad_c(params['wl']), pad_c(params['bl'])
    wr, br = pad_c(params['wr']), pad_c(params['br'])
    bgat = pad_c(params['bgat'])

    xl_f32 = jnp.pad(x @ wl + bl, ((0, n_pad - N), (0, 0)))    # [n_pad, C_PAD] source msgs
    xr = jnp.pad(x @ wr + br, ((0, n_pad - N), (0, 0)))        # [n_pad, C_PAD] target term
    xlT = xl_f32[:, :C].T                                      # [C, n_pad] f32 (tiny, resident)
    xl = xl_f32.astype(jnp.bfloat16)                           # bf16 MXU operand (resident)
    we_vec = params['we'][0]                                   # (C,) -> SMEM scalars
    att_vec = params['att'][0]                                 # (C,) -> SMEM scalars

    grid = (n_pad // tile_i,)
    kernel = functools.partial(_biggat_kernel, C, NEG_SLOPE)

    flops = int(2 * n_pad * n_pad * C_PAD + 8 * n_pad * n_pad * C)
    bytes_accessed = int(n_pad * n_pad * 4 + n_pad * C_PAD * 10)

    def _call(single_buffer_resident):
        def resident(shape):
            if single_buffer_resident:
                return pl.BlockSpec(shape, lambda i: (0, 0),
                                    pipeline_mode=pl.Buffered(1))
            return pl.BlockSpec(shape, lambda i: (0, 0))

        return pl.pallas_call(
            kernel,
            out_shape=jax.ShapeDtypeStruct((n_pad, C_PAD), jnp.float32),
            grid=grid,
            in_specs=[
                pl.BlockSpec(memory_space=pltpu.MemorySpace.SMEM),   # we  (C,)
                pl.BlockSpec(memory_space=pltpu.MemorySpace.SMEM),   # att (C,)
                resident((n_pad, C_PAD)),                            # xl  (bf16, resident)
                resident((C, n_pad)),                                # xl^T (f32, resident)
                pl.BlockSpec((tile_i, C_PAD), lambda i: (i, 0)),     # xr  (target tile)
                pl.BlockSpec((tile_i, n_pad), lambda i: (i, 0)),     # e_dense rows (bf16)
                pl.BlockSpec((tile_i, n_pad), lambda i: (i, 0)),     # mask bias rows (bf16)
                resident((1, C_PAD)),                                # GAT bias
            ],
            out_specs=pl.BlockSpec((tile_i, C_PAD), lambda i: (i, 0)),
            compiler_params=pltpu.CompilerParams(
                dimension_semantics=("parallel",),
                vmem_limit_bytes=vmem_limit,
            ),
            cost_estimate=pl.CostEstimate(
                flops=flops,
                transcendentals=int(n_pad * n_pad + n_pad),
                bytes_accessed=bytes_accessed,
            ),
        )(we_vec, att_vec, xl, xlT, xr, e_dense, bias, bgat)

    try:
        node_out = _call(True)
    except Exception:
        # TODO(synk): pipeline_mode=pl.Buffered(1) unsupported on this jax build;
        # fall back to default double-buffering of the grid-invariant inputs.
        node_out = _call(False)

    # global_mean_pool + classifier outside the gridded kernel (tiny matmuls)
    onehot = (batch[None, :] == jnp.arange(num_graphs)[:, None]).astype(jnp.float32)
    counts = jnp.sum(onehot, axis=1, keepdims=True)
    pool = onehot / jnp.maximum(counts, 1.0)                   # [B, N]
    pooled = pool @ node_out[:N, :C]                           # [B, C]
    y = pooled @ params['w1'] + params['b1']                   # [B, num_classes]

    if num_classes == 1:
        return y.reshape(-1)
    return y


if __name__ == "__main__":
    key = jax.random.PRNGKey(0)
    num_node_features = 8
    num_classes = 3
    N = 16          # total nodes across the batch
    B = 2           # number of graphs

    kx, ke, kp = jax.random.split(key, 3)
    x = jax.random.normal(kx, (N, num_node_features), jnp.float32)

    # two 8-node bidirectional rings (no self loops, no duplicate edges)
    s0 = jnp.arange(8); d0 = (s0 + 1) % 8
    s1 = jnp.arange(8) + 8; d1 = (jnp.arange(8) + 1) % 8 + 8
    src = jnp.concatenate([s0, d0, s1, d1])
    dst = jnp.concatenate([d0, s0, d1, s1])
    edge_index = jnp.stack([src, dst]).astype(jnp.int32)
    edge_attr = jax.random.uniform(ke, (edge_index.shape[1], 1), jnp.float32)
    batch = jnp.concatenate([jnp.zeros(8, jnp.int32), jnp.ones(8, jnp.int32)])

    params, C = init_params(kp, num_node_features, num_classes)
    y = biggat_forward(x, edge_index, edge_attr, batch, params, num_classes, B)
    jax.block_until_ready(y)
    assert y.shape == (B, num_classes)
    assert bool(jnp.all(jnp.isfinite(y)))
    print("KERNEL_OK")
</pallas_src>

<mosaic_0001>
module attributes {stable_mosaic.version = 11 : i64} {
  func.func @_biggat_kernel(%arg0: i32, %arg1: memref<4xf32, #tpu.memory_space<smem>>, %arg2: memref<4xf32, #tpu.memory_space<smem>>, %arg3: memref<16x128xbf16, #tpu.memory_space<vmem>>, %arg4: memref<4x16xf32, #tpu.memory_space<vmem>>, %arg5: memref<16x128xf32, #tpu.memory_space<vmem>>, %arg6: memref<16x16xbf16, #tpu.memory_space<vmem>>, %arg7: memref<16x16xbf16, #tpu.memory_space<vmem>>, %arg8: memref<1x128xf32, #tpu.memory_space<vmem>>, %arg9: memref<16x128xf32, #tpu.memory_space<vmem>>) attributes {dimension_semantics = [#tpu.dimension_semantics<parallel>], iteration_bounds = array<i64: 1>, scalar_prefetch = 0 : i64, scratch_operands = 0 : i64, tpu.core_type = #tpu.core_type<tc>, window_params = [{transform_indices = @transform_0, window_bounds = array<i64: 4>}, {transform_indices = @transform_1, window_bounds = array<i64: 4>}, {pipeline_mode = #tpu.pipeline_mode<synchronous>, transform_indices = @transform_2, window_bounds = array<i64: 16, 128>}, {pipeline_mode = #tpu.pipeline_mode<synchronous>, transform_indices = @transform_3, window_bounds = array<i64: 4, 16>}, {transform_indices = @transform_4, window_bounds = array<i64: 16, 128>}, {transform_indices = @transform_5, window_bounds = array<i64: 16, 16>}, {transform_indices = @transform_6, window_bounds = array<i64: 16, 16>}, {pipeline_mode = #tpu.pipeline_mode<synchronous>, transform_indices = @transform_7, window_bounds = array<i64: 1, 128>}, {transform_indices = @transform_8, window_bounds = array<i64: 16, 128>}]} {
    %c0 = arith.constant 0 : index
    %c0_0 = arith.constant 0 : index
    %0 = vector.load %arg6[%c0, %c0_0] : memref<16x16xbf16, #tpu.memory_space<vmem>>, vector<16x16xbf16>
    %1 = arith.extf %0 : vector<16x16xbf16> to vector<16x16xf32>
    %c0_1 = arith.constant 0 : index
    %c0_2 = arith.constant 0 : index
    %2 = vector.load %arg5[%c0_1, %c0_2] : memref<16x128xf32, #tpu.memory_space<vmem>>, vector<16x128xf32>
    %c0_3 = arith.constant 0 : index
    %c0_4 = arith.constant 0 : index
    %3 = vector.load %arg7[%c0_3, %c0_4] : memref<16x16xbf16, #tpu.memory_space<vmem>>, vector<16x16xbf16>
    %4 = arith.extf %3 : vector<16x16xbf16> to vector<16x16xf32>
    %c0_5 = arith.constant 0 : index
    %5 = memref.load %arg1[%c0_5] : memref<4xf32, #tpu.memory_space<smem>>
    %c0_6 = arith.constant 0 : index
    %6 = memref.load %arg2[%c0_6] : memref<4xf32, #tpu.memory_space<smem>>
    %c0_7 = arith.constant 0 : index
    %c0_8 = arith.constant 0 : index
    %7 = vector.load %arg4[%c0_7, %c0_8] : memref<4x16xf32, #tpu.memory_space<vmem>>, vector<1x16xf32>
    %8 = vector.extract_strided_slice %2 {offsets = [0, 0], sizes = [16, 1], strides = [1, 1]} : vector<16x128xf32> to vector<16x1xf32>
    %9 = vector.broadcast %7 : vector<1x16xf32> to vector<16x16xf32>
    %10 = vector.broadcast %8 : vector<16x1xf32> to vector<16x16xf32>
    %11 = arith.addf %9, %10 : vector<16x16xf32>
    %12 = vector.broadcast %5 : f32 to vector<16x16xf32>
    %13 = arith.mulf %1, %12 : vector<16x16xf32>
    %14 = arith.addf %11, %13 : vector<16x16xf32>
    %cst = arith.constant 2.000000e-01 : f32
    %15 = vector.broadcast %cst : f32 to vector<16x16xf32>
    %16 = arith.mulf %15, %14 : vector<16x16xf32>
    %17 = arith.maximumf %14, %16 : vector<16x16xf32>
    %18 = vector.broadcast %6 : f32 to vector<16x16xf32>
    %19 = arith.mulf %18, %17 : vector<16x16xf32>
    %20 = arith.addf %4, %19 : vector<16x16xf32>
    %c1 = arith.constant 1 : index
    %21 = memref.load %arg1[%c1] : memref<4xf32, #tpu.memory_space<smem>>
    %c1_9 = arith.constant 1 : index
    %22 = memref.load %arg2[%c1_9] : memref<4xf32, #tpu.memory_space<smem>>
    %c1_10 = arith.constant 1 : index
    %c0_11 = arith.constant 0 : index
    %23 = vector.load %arg4[%c1_10, %c0_11] : memref<4x16xf32, #tpu.memory_space<vmem>>, vector<1x16xf32>
    %24 = vector.extract_strided_slice %2 {offsets = [0, 1], sizes = [16, 1], strides = [1, 1]} : vector<16x128xf32> to vector<16x1xf32>
    %25 = vector.broadcast %23 : vector<1x16xf32> to vector<16x16xf32>
    %26 = vector.broadcast %24 : vector<16x1xf32> to vector<16x16xf32>
    %27 = arith.addf %25, %26 : vector<16x16xf32>
    %28 = vector.broadcast %21 : f32 to vector<16x16xf32>
    %29 = arith.mulf %1, %28 : vector<16x16xf32>
    %30 = arith.addf %27, %29 : vector<16x16xf32>
    %cst_12 = arith.constant 2.000000e-01 : f32
    %31 = vector.broadcast %cst_12 : f32 to vector<16x16xf32>
    %32 = arith.mulf %31, %30 : vector<16x16xf32>
    %33 = arith.maximumf %30, %32 : vector<16x16xf32>
    %34 = vector.broadcast %22 : f32 to vector<16x16xf32>
    %35 = arith.mulf %34, %33 : vector<16x16xf32>
    %36 = arith.addf %20, %35 : vector<16x16xf32>
    %c2 = arith.constant 2 : index
    %37 = memref.load %arg1[%c2] : memref<4xf32, #tpu.memory_space<smem>>
    %c2_13 = arith.constant 2 : index
    %38 = memref.load %arg2[%c2_13] : memref<4xf32, #tpu.memory_space<smem>>
    %c2_14 = arith.constant 2 : index
    %c0_15 = arith.constant 0 : index
    %39 = vector.load %arg4[%c2_14, %c0_15] : memref<4x16xf32, #tpu.memory_space<vmem>>, vector<1x16xf32>
    %40 = vector.extract_strided_slice %2 {offsets = [0, 2], sizes = [16, 1], strides = [1, 1]} : vector<16x128xf32> to vector<16x1xf32>
    %41 = vector.broadcast %39 : vector<1x16xf32> to vector<16x16xf32>
    %42 = vector.broadcast %40 : vector<16x1xf32> to vector<16x16xf32>
    %43 = arith.addf %41, %42 : vector<16x16xf32>
    %44 = vector.broadcast %37 : f32 to vector<16x16xf32>
    %45 = arith.mulf %1, %44 : vector<16x16xf32>
    %46 = arith.addf %43, %45 : vector<16x16xf32>
    %cst_16 = arith.constant 2.000000e-01 : f32
    %47 = vector.broadcast %cst_16 : f32 to vector<16x16xf32>
    %48 = arith.mulf %47, %46 : vector<16x16xf32>
    %49 = arith.maximumf %46, %48 : vector<16x16xf32>
    %50 = vector.broadcast %38 : f32 to vector<16x16xf32>
    %51 = arith.mulf %50, %49 : vector<16x16xf32>
    %52 = arith.addf %36, %51 : vector<16x16xf32>
    %c3 = arith.constant 3 : index
    %53 = memref.load %arg1[%c3] : memref<4xf32, #tpu.memory_space<smem>>
    %c3_17 = arith.constant 3 : index
    %54 = memref.load %arg2[%c3_17] : memref<4xf32, #tpu.memory_space<smem>>
    %c3_18 = arith.constant 3 : index
    %c0_19 = arith.constant 0 : index
    %55 = vector.load %arg4[%c3_18, %c0_19] : memref<4x16xf32, #tpu.memory_space<vmem>>, vector<1x16xf32>
    %56 = vector.extract_strided_slice %2 {offsets = [0, 3], sizes = [16, 1], strides = [1, 1]} : vector<16x128xf32> to vector<16x1xf32>
    %57 = vector.broadcast %55 : vector<1x16xf32> to vector<16x16xf32>
    %58 = vector.broadcast %56 : vector<16x1xf32> to vector<16x16xf32>
    %59 = arith.addf %57, %58 : vector<16x16xf32>
    %60 = vector.broadcast %53 : f32 to vector<16x16xf32>
    %61 = arith.mulf %1, %60 : vector<16x16xf32>
    %62 = arith.addf %59, %61 : vector<16x16xf32>
    %cst_20 = arith.constant 2.000000e-01 : f32
    %63 = vector.broadcast %cst_20 : f32 to vector<16x16xf32>
    %64 = arith.mulf %63, %62 : vector<16x16xf32>
    %65 = arith.maximumf %62, %64 : vector<16x16xf32>
    %66 = vector.broadcast %54 : f32 to vector<16x16xf32>
    %67 = arith.mulf %66, %65 : vector<16x16xf32>
    %68 = arith.addf %52, %67 : vector<16x16xf32>
    %cst_21 = arith.constant dense<0xFF800000> : vector<16xf32>
    %69 = vector.multi_reduction <maximumf>, %68, %cst_21 [1] : vector<16x16xf32> to vector<16xf32>
    %70 = vector.shape_cast %69 : vector<16xf32> to vector<16x1xf32>
    %71 = vector.broadcast %70 : vector<16x1xf32> to vector<16x16xf32>
    %72 = arith.subf %68, %71 : vector<16x16xf32>
    %73 = math.exp %72 : vector<16x16xf32>
    %cst_22 = arith.constant dense<0.000000e+00> : vector<16xf32>
    %74 = vector.multi_reduction <add>, %73, %cst_22 [1] : vector<16x16xf32> to vector<16xf32>
    %75 = vector.shape_cast %74 : vector<16xf32> to vector<16x1xf32>
    %76 = arith.truncf %73 : vector<16x16xf32> to vector<16x16xbf16>
    %c0_23 = arith.constant 0 : index
    %c0_24 = arith.constant 0 : index
    %77 = vector.load %arg3[%c0_23, %c0_24] : memref<16x128xbf16, #tpu.memory_space<vmem>>, vector<16x128xbf16>
    %cst_25 = arith.constant dense<0.000000e+00> : vector<16x128xf32>
    %78 = tpu.matmul %76, %77, %cst_25 {dimension_numbers = #tpu.dot_dimension_numbers<[1], [0], [0], [1], [0, 0, 1, 1], [], []>} : vector<16x16xbf16>, vector<16x128xbf16>, vector<16x128xf32> -> vector<16x128xf32>
    %79 = tpu.reciprocal %75 {approx = true} : vector<16x1xf32> -> vector<16x1xf32>
    %80 = vector.broadcast %79 : vector<16x1xf32> to vector<16x128xf32>
    %81 = arith.mulf %78, %80 : vector<16x128xf32>
    %c0_26 = arith.constant 0 : index
    %c0_27 = arith.constant 0 : index
    %82 = vector.load %arg8[%c0_26, %c0_27] : memref<1x128xf32, #tpu.memory_space<vmem>>, vector<1x128xf32>
    %83 = vector.broadcast %82 : vector<1x128xf32> to vector<16x128xf32>
    %84 = arith.addf %81, %83 : vector<16x128xf32>
    %cst_28 = arith.constant 0.000000e+00 : f32
    %85 = vector.broadcast %cst_28 : f32 to vector<16x128xf32>
    %86 = arith.maximumf %84, %85 : vector<16x128xf32>
    %c0_29 = arith.constant 0 : index
    %c0_30 = arith.constant 0 : index
    %87 = vector.load %arg9[%c0_29, %c0_30] : memref<16x128xf32, #tpu.memory_space<vmem>>, vector<16x128xf32>
    tpu.vector_store %arg9[%c0_29, %c0_30], %86 {strides = array<i32>} : memref<16x128xf32, #tpu.memory_space<vmem>>, vector<16x128xf32>,
    return
  }
  func.func @transform_0(%arg0: i32) -> i32 {
    %c0_i32 = arith.constant 0 : i32
    %c0_i32_0 = arith.constant 0 : i32
    return %c0_i32 : i32
  }
  func.func @transform_1(%arg0: i32) -> i32 {
    %c0_i32 = arith.constant 0 : i32
    %c0_i32_0 = arith.constant 0 : i32
    return %c0_i32 : i32
  }
  func.func @transform_2(%arg0: i32) -> (i32, i32) {
    %c0_i32 = arith.constant 0 : i32
    %c0_i32_0 = arith.constant 0 : i32
    %c0_i32_1 = arith.constant 0 : i32
    return %c0_i32, %c0_i32_0 : i32, i32
  }
  func.func @transform_3(%arg0: i32) -> (i32, i32) {
    %c0_i32 = arith.constant 0 : i32
    %c0_i32_0 = arith.constant 0 : i32
    %c0_i32_1 = arith.constant 0 : i32
    return %c0_i32, %c0_i32_0 : i32, i32
  }
  func.func @transform_4(%arg0: i32) -> (i32, i32) {
    %c0_i32 = arith.constant 0 : i32
    %c0_i32_0 = arith.constant 0 : i32
    return %arg0, %c0_i32 : i32, i32
  }
  func.func @transform_5(%arg0: i32) -> (i32, i32) {
    %c0_i32 = arith.constant 0 : i32
    %c0_i32_0 = arith.constant 0 : i32
    return %arg0, %c0_i32 : i32, i32
  }
  func.func @transform_6(%arg0: i32) -> (i32, i32) {
    %c0_i32 = arith.constant 0 : i32
    %c0_i32_0 = arith.constant 0 : i32
    return %arg0, %c0_i32 : i32, i32
  }
  func.func @transform_7(%arg0: i32) -> (i32, i32) {
    %c0_i32 = arith.constant 0 : i32
    %c0_i32_0 = arith.constant 0 : i32
    %c0_i32_1 = arith.constant 0 : i32
    return %c0_i32, %c0_i32_0 : i32, i32
  }
  func.func @transform_8(%arg0: i32) -> (i32, i32) {
    %c0_i32 = arith.constant 0 : i32
    %c0_i32_0 = arith.constant 0 : i32
    return %arg0, %c0_i32 : i32, i32
  }
}

module attributes {stable_mosaic.version = 11 : i64} {
  func.func @_biggat_kernel(%arg0: i32, %arg1: memref<4xf32, #tpu.memory_space<smem>>, %arg2: memref<4xf32, #tpu.memory_space<smem>>, %arg3: memref<16x128xbf16, #tpu.memory_space<vmem>>, %arg4: memref<4x16xf32, #tpu.memory_space<vmem>>, %arg5: memref<16x128xf32, #tpu.memory_space<vmem>>, %arg6: memref<16x16xbf16, #tpu.memory_space<vmem>>, %arg7: memref<16x16xbf16, #tpu.memory_space<vmem>>, %arg8: memref<1x128xf32, #tpu.memory_space<vmem>>, %arg9: memref<16x128xf32, #tpu.memory_space<vmem>>) attributes {dimension_semantics = [#tpu.dimension_semantics<parallel>], iteration_bounds = array<i64: 1>, scalar_prefetch = 0 : i64, scratch_operands = 0 : i64, tpu.core_type = #tpu.core_type<tc>, window_params = [{transform_indices = @transform_0, window_bounds = array<i64: 4>}, {transform_indices = @transform_1, window_bounds = array<i64: 4>}, {pipeline_mode = #tpu.pipeline_mode<synchronous>, transform_indices = @transform_2, window_bounds = array<i64: 16, 128>}, {pipeline_mode = #tpu.pipeline_mode<synchronous>, transform_indices = @transform_3, window_bounds = array<i64: 4, 16>}, {transform_indices = @transform_4, window_bounds = array<i64: 16, 128>}, {transform_indices = @transform_5, window_bounds = array<i64: 16, 16>}, {transform_indices = @transform_6, window_bounds = array<i64: 16, 16>}, {pipeline_mode = #tpu.pipeline_mode<synchronous>, transform_indices = @transform_7, window_bounds = array<i64: 1, 128>}, {transform_indices = @transform_8, window_bounds = array<i64: 16, 128>}]} {
    %c0 = arith.constant 0 : index
    %c0_0 = arith.constant 0 : index
    %0 = vector.load %arg6[%c0, %c0_0] : memref<16x16xbf16, #tpu.memory_space<vmem>>, vector<16x16xbf16>
    %1 = arith.extf %0 : vector<16x16xbf16> to vector<16x16xf32>
    %c0_1 = arith.constant 0 : index
    %c0_2 = arith.constant 0 : index
    %2 = vector.load %arg5[%c0_1, %c0_2] : memref<16x128xf32, #tpu.memory_space<vmem>>, vector<16x128xf32>
    %c0_3 = arith.constant 0 : index
    %c0_4 = arith.constant 0 : index
    %3 = vector.load %arg7[%c0_3, %c0_4] : memref<16x16xbf16, #tpu.memory_space<vmem>>, vector<16x16xbf16>
    %4 = arith.extf %3 : vector<16x16xbf16> to vector<16x16xf32>
    %c0_5 = arith.constant 0 : index
    %5 = memref.load %arg1[%c0_5] : memref<4xf32, #tpu.memory_space<smem>>
    %c0_6 = arith.constant 0 : index
    %6 = memref.load %arg2[%c0_6] : memref<4xf32, #tpu.memory_space<smem>>
    %c0_7 = arith.constant 0 : index
    %c0_8 = arith.constant 0 : index
    %7 = vector.load %arg4[%c0_7, %c0_8] : memref<4x16xf32, #tpu.memory_space<vmem>>, vector<1x16xf32>
    %8 = vector.extract_strided_slice %2 {offsets = [0, 0], sizes = [16, 1], strides = [1, 1]} : vector<16x128xf32> to vector<16x1xf32>
    %9 = vector.broadcast %7 : vector<1x16xf32> to vector<16x16xf32>
    %10 = vector.broadcast %8 : vector<16x1xf32> to vector<16x16xf32>
    %11 = arith.addf %9, %10 : vector<16x16xf32>
    %12 = vector.broadcast %5 : f32 to vector<16x16xf32>
    %13 = arith.mulf %1, %12 : vector<16x16xf32>
    %14 = arith.addf %11, %13 : vector<16x16xf32>
    %cst = arith.constant 2.000000e-01 : f32
    %15 = vector.broadcast %cst : f32 to vector<16x16xf32>
    %16 = arith.mulf %15, %14 : vector<16x16xf32>
    %17 = arith.maximumf %14, %16 : vector<16x16xf32>
    %18 = vector.broadcast %6 : f32 to vector<16x16xf32>
    %19 = arith.mulf %18, %17 : vector<16x16xf32>
    %20 = arith.addf %4, %19 : vector<16x16xf32>
    %c1 = arith.constant 1 : index
    %21 = memref.load %arg1[%c1] : memref<4xf32, #tpu.memory_space<smem>>
    %c1_9 = arith.constant 1 : index
    %22 = memref.load %arg2[%c1_9] : memref<4xf32, #tpu.memory_space<smem>>
    %c1_10 = arith.constant 1 : index
    %c0_11 = arith.constant 0 : index
    %23 = vector.load %arg4[%c1_10, %c0_11] : memref<4x16xf32, #tpu.memory_space<vmem>>, vector<1x16xf32>
    %24 = vector.extract_strided_slice %2 {offsets = [0, 1], sizes = [16, 1], strides = [1, 1]} : vector<16x128xf32> to vector<16x1xf32>
    %25 = vector.broadcast %23 : vector<1x16xf32> to vector<16x16xf32>
    %26 = vector.broadcast %24 : vector<16x1xf32> to vector<16x16xf32>
    %27 = arith.addf %25, %26 : vector<16x16xf32>
    %28 = vector.broadcast %21 : f32 to vector<16x16xf32>
    %29 = arith.mulf %1, %28 : vector<16x16xf32>
    %30 = arith.addf %27, %29 : vector<16x16xf32>
    %cst_12 = arith.constant 2.000000e-01 : f32
    %31 = vector.broadcast %cst_12 : f32 to vector<16x16xf32>
    %32 = arith.mulf %31, %30 : vector<16x16xf32>
    %33 = arith.maximumf %30, %32 : vector<16x16xf32>
    %34 = vector.broadcast %22 : f32 to vector<16x16xf32>
    %35 = arith.mulf %34, %33 : vector<16x16xf32>
    %36 = arith.addf %20, %35 : vector<16x16xf32>
    %c2 = arith.constant 2 : index
    %37 = memref.load %arg1[%c2] : memref<4xf32, #tpu.memory_space<smem>>
    %c2_13 = arith.constant 2 : index
    %38 = memref.load %arg2[%c2_13] : memref<4xf32, #tpu.memory_space<smem>>
    %c2_14 = arith.constant 2 : index
    %c0_15 = arith.constant 0 : index
    %39 = vector.load %arg4[%c2_14, %c0_15] : memref<4x16xf32, #tpu.memory_space<vmem>>, vector<1x16xf32>
    %40 = vector.extract_strided_slice %2 {offsets = [0, 2], sizes = [16, 1], strides = [1, 1]} : vector<16x128xf32> to vector<16x1xf32>
    %41 = vector.broadcast %39 : vector<1x16xf32> to vector<16x16xf32>
    %42 = vector.broadcast %40 : vector<16x1xf32> to vector<16x16xf32>
    %43 = arith.addf %41, %42 : vector<16x16xf32>
    %44 = vector.broadcast %37 : f32 to vector<16x16xf32>
    %45 = arith.mulf %1, %44 : vector<16x16xf32>
    %46 = arith.addf %43, %45 : vector<16x16xf32>
    %cst_16 = arith.constant 2.000000e-01 : f32
    %47 = vector.broadcast %cst_16 : f32 to vector<16x16xf32>
    %48 = arith.mulf %47, %46 : vector<16x16xf32>
    %49 = arith.maximumf %46, %48 : vector<16x16xf32>
    %50 = vector.broadcast %38 : f32 to vector<16x16xf32>
    %51 = arith.mulf %50, %49 : vector<16x16xf32>
    %52 = arith.addf %36, %51 : vector<16x16xf32>
    %c3 = arith.constant 3 : index
    %53 = memref.load %arg1[%c3] : memref<4xf32, #tpu.memory_space<smem>>
    %c3_17 = arith.constant 3 : index
    %54 = memref.load %arg2[%c3_17] : memref<4xf32, #tpu.memory_space<smem>>
    %c3_18 = arith.constant 3 : index
    %c0_19 = arith.constant 0 : index
    %55 = vector.load %arg4[%c3_18, %c0_19] : memref<4x16xf32, #tpu.memory_space<vmem>>, vector<1x16xf32>
    %56 = vector.extract_strided_slice %2 {offsets = [0, 3], sizes = [16, 1], strides = [1, 1]} : vector<16x128xf32> to vector<16x1xf32>
    %57 = vector.broadcast %55 : vector<1x16xf32> to vector<16x16xf32>
    %58 = vector.broadcast %56 : vector<16x1xf32> to vector<16x16xf32>
    %59 = arith.addf %57, %58 : vector<16x16xf32>
    %60 = vector.broadcast %53 : f32 to vector<16x16xf32>
    %61 = arith.mulf %1, %60 : vector<16x16xf32>
    %62 = arith.addf %59, %61 : vector<16x16xf32>
    %cst_20 = arith.constant 2.000000e-01 : f32
    %63 = vector.broadcast %cst_20 : f32 to vector<16x16xf32>
    %64 = arith.mulf %63, %62 : vector<16x16xf32>
    %65 = arith.maximumf %62, %64 : vector<16x16xf32>
    %66 = vector.broadcast %54 : f32 to vector<16x16xf32>
    %67 = arith.mulf %66, %65 : vector<16x16xf32>
    %68 = arith.addf %52, %67 : vector<16x16xf32>
    %cst_21 = arith.constant dense<0xFF800000> : vector<16xf32>
    %69 = vector.multi_reduction <maximumf>, %68, %cst_21 [1] : vector<16x16xf32> to vector<16xf32>
    %70 = vector.shape_cast %69 : vector<16xf32> to vector<16x1xf32>
    %71 = vector.broadcast %70 : vector<16x1xf32> to vector<16x16xf32>
    %72 = arith.subf %68, %71 : vector<16x16xf32>
    %73 = math.exp %72 : vector<16x16xf32>
    %cst_22 = arith.constant dense<0.000000e+00> : vector<16xf32>
    %74 = vector.multi_reduction <add>, %73, %cst_22 [1] : vector<16x16xf32> to vector<16xf32>
    %75 = vector.shape_cast %74 : vector<16xf32> to vector<16x1xf32>
    %76 = arith.truncf %73 : vector<16x16xf32> to vector<16x16xbf16>
    %c0_23 = arith.constant 0 : index
    %c0_24 = arith.constant 0 : index
    %77 = vector.load %arg3[%c0_23, %c0_24] : memref<16x128xbf16, #tpu.memory_space<vmem>>, vector<16x128xbf16>
    %cst_25 = arith.constant dense<0.000000e+00> : vector<16x128xf32>
    %78 = tpu.matmul %76, %77, %cst_25 {dimension_numbers = #tpu.dot_dimension_numbers<[1], [0], [0], [1], [0, 0, 1, 1], [], []>} : vector<16x16xbf16>, vector<16x128xbf16>, vector<16x128xf32> -> vector<16x128xf32>
    %79 = tpu.reciprocal %75 {approx = true} : vector<16x1xf32> -> vector<16x1xf32>
    %80 = vector.broadcast %79 : vector<16x1xf32> to vector<16x128xf32>
    %81 = arith.mulf %78, %80 : vector<16x128xf32>
    %c0_26 = arith.constant 0 : index
    %c0_27 = arith.constant 0 : index
    %82 = vector.load %arg8[%c0_26, %c0_27] : memref<1x128xf32, #tpu.memory_space<vmem>>, vector<1x128xf32>
    %83 = vector.broadcast %82 : vector<1x128xf32> to vector<16x128xf32>
    %84 = arith.addf %81, %83 : vector<16x128xf32>
    %cst_28 = arith.constant 0.000000e+00 : f32
    %85 = vector.broadcast %cst_28 : f32 to vector<16x128xf32>
    %86 = arith.maximumf %84, %85 : vector<16x128xf32>
    %c0_29 = arith.constant 0 : index
    %c0_30 = arith.constant 0 : index
    %87 = vector.load %arg9[%c0_29, %c0_30] : memref<16x128xf32, #tpu.memory_space<vmem>>, vector<16x128xf32>
    tpu.vector_store %arg9[%c0_29, %c0_30], %86 {strides = array<i32>} : memref<16x128xf32, #tpu.memory_space<vmem>>, vector<16x128xf32>,
    return
  }
  func.func @transform_0(%arg0: i32) -> i32 {
    %c0_i32 = arith.constant 0 : i32
    %c0_i32_0 = arith.constant 0 : i32
    return %c0_i32 : i32
  }
  func.func @transform_1(%arg0: i32) -> i32 {
    %c0_i32 = arith.constant 0 : i32
    %c0_i32_0 = arith.constant 0 : i32
    return %c0_i32 : i32
  }
  func.func @transform_2(%arg0: i32) -> (i32, i32) {
    %c0_i32 = arith.constant 0 : i32
    %c0_i32_0 = arith.constant 0 : i32
    %c0_i32_1 = arith.constant 0 : i32
    return %c0_i32, %c0_i32_0 : i32, i32
  }
  func.func @transform_3(%arg0: i32) -> (i32, i32) {
    %c0_i32 = arith.constant 0 : i32
    %c0_i32_0 = arith.constant 0 : i32
    %c0_i32_1 = arith.constant 0 : i32
    return %c0_i32, %c0_i32_0 : i32, i32
  }
  func.func @transform_4(%arg0: i32) -> (i32, i32) {
    %c0_i32 = arith.constant 0 : i32
    %c0_i32_0 = arith.constant 0 : i32
    return %arg0, %c0_i32 : i32, i32
  }
  func.func @transform_5(%arg0: i32) -> (i32, i32) {
    %c0_i32 = arith.constant 0 : i32
    %c0_i32_0 = arith.constant 0 : i32
    return %arg0, %c0_i32 : i32, i32
  }
  func.func @transform_6(%arg0: i32) -> (i32, i32) {
    %c0_i32 = arith.constant 0 : i32
    %c0_i32_0 = arith.constant 0 : i32
    return %arg0, %c0_i32 : i32, i32
  }
  func.func @transform_7(%arg0: i32) -> (i32, i32) {
    %c0_i32 = arith.constant 0 : i32
    %c0_i32_0 = arith.constant 0 : i32
    %c0_i32_1 = arith.constant 0 : i32
    return %c0_i32, %c0_i32_0 : i32, i32
  }
  func.func @transform_8(%arg0: i32) -> (i32, i32) {
    %c0_i32 = arith.constant 0 : i32
    %c0_i32_0 = arith.constant 0 : i32
    return %arg0, %c0_i32 : i32, i32
  }
}

</mosaic_0001>

<bundles_post_ra>
// kernel: tpu_custom_call.1
= control target key start
LH: loop header
LB: loop body
LE: loop exit
PB: predicated region body
PF: predicated region fallthrough
CT: control target
= control target key end

     0   :  { %13 = vsyncpa [#allocation5], 0  ;;  %s661_s0 = inlined_call_operand.hbm [shape: f32[4], index: 0, kind: input, shape index: {}]   ;;  %s662_s1 = inlined_call_operand.vmem [shape: f32[4], index: 1, kind: input, shape index: {}]   ;;  %s663_s2 = inlined_call_operand.hbm [shape: bf16[16,128], index: 2, kind: input, shape index: {}]   ;;  %s664_s3 = inlined_call_operand.hbm [shape: f32[4,16], index: 3, kind: input, shape index: {}]   ;;  %s665_s4 = inlined_call_operand.hbm [shape: f32[16,128], index: 4, kind: input, shape index: {}]   ;;  %s666_s5 = inlined_call_operand.vmem [shape: bf16[16,16], index: 5, kind: input, shape index: {}]   ;;  %s667_s6 = inlined_call_operand.hbm [shape: bf16[16,16], index: 6, kind: input, shape index: {}]   ;;  %s668_s7 = inlined_call_operand.vmem [shape: f32[1,128], index: 7, kind: input, shape index: {}]   ;;  %s669_s8 = inlined_call_operand.hbm [shape: f32[16,128], index: 8, kind: output, shape index: {}]  }
   0x1   :  { %14 = vsyncpa [#allocation6], 0 }
   0x2   :  { %15 = vsyncpa [#allocation3], 0 }
   0x3   :  { %16 = vsyncpa [#allocation10], 0 }
   0x4   :  { %17 = vsyncpa [#allocation13], 0 }
   0x5   :  { %18 = vsyncpa [#allocation4], 0  ;;  %s546_s27 = smov [#allocation9]   ;;  %s33_s9 = sshll.u32 %s662_s1, 4  ;;  %s34_s9 = int_to_ptr.vmem [resolvable:$true] %s33_s9 }
   0x6   :  { %s55_s28 = sshll.u32 %s546_s27, 4  ;;  %s56_s28 = int_to_ptr.vmem [resolvable:$true] %s55_s28 }
   0x7   :  { %s422_s10 = scalar_lea.vmem %s56_s28, 64  ;;  %p427_p1 = scmp.lt.s32.totalorder %s56_s28, %s56_s28 }
   0x8   :  { %p423_p0 = scmp.ne.s32.totalorder %s56_s28, %s422_s10  ;;  %p428_p2 = scmp.lt.s32.totalorder %s422_s10, %s422_s10 }
   0xa   :  { %p429_p3 = por %p428_p2, %p427_p1 }
   0xc   :  { %p430_p4 = pnand %p429_p3, %p423_p0 }
   0xe   :  { %433 = shalt.err (!%p430_p4)
}
   0xf   :  { %58 = dma.hbm_to_vmem [thread:$0]  %s664_s3, 64, %s56_s28, [#allocation10]  }
  0x10   :  { %s547_s13 = smov [#allocation2]   ;;  %s442_s16 = scalar_lea.vmem %s34_s9, 16 }
  0x11   :  { %26 = dma.hbm_to_smem %s661_s0, 16, %s547_s13, [#allocation5]  }
  0x12   :  { %p443_p5 = scmp.ne.s32.totalorder %s34_s9, %s442_s16  ;;  %p447_p6 = scmp.lt.s32.totalorder %s34_s9, %s34_s9 }
  0x13   :  { %p448_p7 = scmp.lt.s32.totalorder %s442_s16, %s442_s16 }
  0x15   :  { %p449_p8 = por %p448_p7, %p447_p6 }
  0x17   :  { %p450_p9 = pnand %p449_p8, %p443_p5 }
  0x19   :  { %453 = shalt.err (!%p450_p9)
}
  0x1a   :  { %s548_s1 = smov [#allocation7]   ;;  %s549_s17 = smov [#allocation8]  }
  0x1b   :  { %36 = dma.vmem_to_smem %s34_s9, 16, %s548_s1, [#allocation6]  }
  0x1c   :  { %s42_s18 = sshll.u32 %s549_s17, 4  ;;  %s43_s18 = int_to_ptr.vmem [resolvable:$true] %s42_s18 }
  0x1d   :  { %s462_s19 = scalar_lea.vmem %s43_s18, 128  ;;  %p467_p11 = scmp.lt.s32.totalorder %s43_s18, %s43_s18 }
  0x1e   :  { %p463_p10 = scmp.ne.s32.totalorder %s43_s18, %s462_s19  ;;  %p468_p12 = scmp.lt.s32.totalorder %s462_s19, %s462_s19 }
  0x20   :  { %p469_p13 = por %p468_p12, %p467_p11 }
  0x22   :  { %p470_p0 = pnand %p469_p13, %p463_p10 }
  0x24   :  { %473 = shalt.err (!%p470_p0)
}
  0x25   :  { %s550_s0 = smov 64   ;;  %s551_s3 = smov 4  }
  0x26   :  { %48 = dma.hbm_to_vmem [thread:$0]  %s663_s2, 128, %s43_s18, [#allocation3], %s550_s0, %s550_s0, %s551_s3  }
  0x27   :  { %s552_s22 = smov [#allocation11]  }
  0x28   :  { %s64_s23 = sshll.u32 %s552_s22, 4  ;;  %s65_s23 = int_to_ptr.vmem [resolvable:$true] %s64_s23 }
  0x29   :  { %s482_s24 = scalar_lea.vmem %s65_s23, 256  ;;  %p487_p2 = scmp.lt.s32.totalorder %s65_s23, %s65_s23 }
  0x2a   :  { %p483_p1 = scmp.ne.s32.totalorder %s65_s23, %s482_s24  ;;  %p488_p3 = scmp.lt.s32.totalorder %s482_s24, %s482_s24 }
  0x2c   :  { %p489_p4 = por %p488_p3, %p487_p2 }
  0x2e   :  { %p490_p5 = pnand %p489_p4, %p483_p1 }
  0x30   :  { %493 = shalt.err (!%p490_p5)
}
  0x31   :  { %s553_s25 = smov 128   ;;  %s554_s26 = smov 8  }
  0x32   :  { %70 = dma.hbm_to_vmem [thread:$0]  %s665_s4, 256, %s65_s23, [#allocation10], %s553_s25, %s553_s25, %s554_s26  }
  0x33   :  { %s555_s2 = smov [#allocation12]  }
  0x34   :  { %s78_s29 = sshll.u32 %s555_s2, 4  ;;  %s79_s29 = int_to_ptr.vmem [resolvable:$true] %s78_s29 }
  0x35   :  { %s502_s30 = scalar_lea.vmem %s79_s29, 128  ;;  %p507_p7 = scmp.lt.s32.totalorder %s79_s29, %s79_s29 }
  0x36   :  { %p503_p6 = scmp.ne.s32.totalorder %s79_s29, %s502_s30  ;;  %p508_p8 = scmp.lt.s32.totalorder %s502_s30, %s502_s30 }
  0x38   :  { %p509_p9 = por %p508_p8, %p507_p7 }
  0x3a   :  { %p510_p10 = pnand %p509_p9, %p503_p6 }
  0x3c   :  { %513 = shalt.err (!%p510_p10)
}
  0x3d   :  { %84 = dma.hbm_to_vmem [thread:$0]  %s667_s6, 128, %s79_s29, [#allocation13], %s550_s0, %s550_s0, %s551_s3  }
  0x3e   :  { %534 = dma.done.wait [#allocation5], 16  }
  0x3f   :  { %535 = vsyncadd [#allocation5], 4294967280 }
  0x40   :  { %536 = dma.done.wait [#allocation6], 16  }
  0x41   :  { %537 = vsyncadd [#allocation6], 4294967280 }
  0x42   :  { %538 = dma.done.wait [#allocation3], 128  }
  0x43   :  { %539 = vsyncadd [#allocation3], 4294967168 }
  0x44   :  { %540 = dma.done.wait [#allocation10], 320  }
  0x45   :  { %541 = vsyncadd [#allocation10], 4294966976 }
  0x46   :  { %542 = dma.done.wait [#allocation13], 128  }
  0x47   :  { %543 = vsyncadd [#allocation13], 4294967168 }
  0x48   :  { %105 = sfence }
  0x49   :  { %v111_v0 = vld [vmem:[#allocation11] sm:$0xff]  ;;  %v556_v1 = vmov 1   ;;  %v557_v2 = vmov 0   ;;  %v112_v3 = vld [vmem:[#allocation11 + $0x8] sm:$0xff]  ;;  %v558_v4 = vmov 2   ;;  %v559_v5 = vmov 3  }
  0x4a   :  { %400 = vset.pattern.permute.xlu1 %v556_v1  ;;  %399 = vset.pattern.permute.xlu0 %v557_v2  ;;  %s117_s4 = sld [smem:[#allocation2]]  ;;  %v367_v6 = vld [vmem:[%s666_s5] sm:$0xff]   ;;  %v353_v9 = vld [vmem:[#allocation9] ss:$0 sm:$0xff]  ;;  %v356_v10 = vld [vmem:[#allocation9 + $0x1] ss:$0 sm:$0xff] }
  0x4b   :  { %158 = vperm.xlu1 %400, %v111_v0   ;;  %126 = vperm.xlu0 %399, %v111_v0   ;;  %s354_s6 = sld [smem:[#allocation2 + $0x1]]  ;;  %v368_v7 = vunpack.c.l.bf16 %v367_v6  ;;  %v369_v13 = vunpack.c.h.bf16 %v367_v6  ;;  %v359_v31 = vld [vmem:[#allocation9 + $0x2] ss:$0 sm:$0xff]  ;;  %v371_v40 = vld [vmem:[#allocation12] sm:$0xff]   ;;  %v362_v50 = vld [vmem:[#allocation9 + $0x3] ss:$0 sm:$0xff] }
  0x4c   :  { %s357_s13 = sld [smem:[#allocation2 + $0x2]]  ;;  %v373_v46 = vunpack.c.h.bf16 %v371_v40  ;;  %v372_v51 = vunpack.c.l.bf16 %v371_v40  ;;  %vm243_vm0 = vcmask 130048   ;;  %vm561_vm1 = vmmov 0   ;;  %s562_s19 = smov [#allocation14]  }
  0x4d   :  { %s632_s14 = sld [smem:[#allocation7]]  ;;  %s337_s0 = sshll.u32 %s562_s19, 4  ;;  %s338_s0 = int_to_ptr.vmem [resolvable:$true] %s337_s0 }
  0x4e   :  { %s634_s15 = sld [smem:[#allocation2 + $0x3]]  ;;  %s514_s3 = scalar_lea.vmem %s338_s0, 256 }
  0x4f   :  { %162 = vperm.xlu1 %400, %v112_v3   ;;  %131 = vperm.xlu0 %399, %v112_v3   ;;  %s636_s5 = sld [smem:[#allocation7 + $0x1]]  ;;  %p515_p11 = scmp.ne.s32.totalorder %s338_s0, %s514_s3 }
  0x50   :  { %v136_v8 = vstv %s117_s4  ;;  %s638_s16 = sld [smem:[#allocation7 + $0x2]]  ;;  %p519_p12 = scmp.lt.s32.totalorder %s338_s0, %s338_s0 }
  0x51   :  { %v167_v11 = vstv %s354_s6  ;;  %v137_v12 = vmul.f32 %v368_v7, %v136_v8  ;;  %v138_v21 = vmul.f32 %v369_v13, %v136_v8  ;;  %s642_s1 = sld [smem:[#allocation7 + $0x3]]  ;;  %p520_p13 = scmp.lt.s32.totalorder %s514_s3, %s514_s3 }
  0x52   :  { %v168_v18 = vmul.f32 %v368_v7, %v167_v11  ;;  %v169_v20 = vmul.f32 %v369_v13, %v167_v11  ;;  %v198_v27 = vstv %s357_s13 }
  0x53   :  { %402 = vset.pattern.permute.xlu1 %v558_v4  ;;  %401 = vset.pattern.permute.xlu0 %v558_v4  ;;  %v200_v32 = vmul.f32 %v369_v13, %v198_v27  ;;  %v199_v33 = vmul.f32 %v368_v7, %v198_v27  ;;  %v145_v34 = vstv %s632_s14  ;;  %v560_v27 = vmov 0.0   ;;  %p521_p0 = por %p520_p13, %p519_p12 }
  0x54   :  { %193 = vperm.xlu1 %402, %v112_v3   ;;  %189 = vperm.xlu0 %401, %v111_v0   ;;  %v229_v44 = vstv %s634_s15 }
  0x55   :  { %v230_v54 = vmul.f32 %v368_v7, %v229_v44  ;;  %v231_v55 = vmul.f32 %v369_v13, %v229_v44  ;;  %v176_v61 = vstv %s636_s5  ;;  %376 = vmatprep.subr.bf16.mxu0 %v560_v27  ;;  %378 = vmatprep.mubr.msk.bf16.mxu0 %vm561_vm1, %v560_v27  ;;  %p522_p1 = pnand %p521_p0, %p515_p11 }
  0x56   :  { %v207_v4 = vstv %s638_s16 }
  0x58   :  { %403 = vset.pattern.permute.xlu1 %v559_v5  ;;  %404 = vset.pattern.permute.xlu0 %v559_v5 }
  0x59   :  { %220 = vperm.xlu1 %403, %v111_v0   ;;  %224 = vperm.xlu0 %404, %v112_v3  }
  0xc6   :  { %v159_v14 = vpop.permute.xlu1 %158  ;;  %v127_v15 = vpop.permute.xlu0 %126 }
  0xc7   :  { %v134_v16 = vadd.f32 %v353_v9, %v127_v15  ;;  %v165_v17 = vadd.f32 %v356_v10, %v159_v14  ;;  %v238_v14 = vstv %s642_s1 }
  0xc9   :  { %v139_v19 = vadd.f32 %v137_v12, %v134_v16  ;;  %v170_v28 = vadd.f32 %v168_v18, %v165_v17 }
  0xca   :  { %v163_v22 = vpop.permute.xlu1 %162  ;;  %v132_v23 = vpop.permute.xlu0 %131 }
  0xcb   :  { %v141_v24 = vmul.f32 0.2, %v139_v19  ;;  %v166_v25 = vadd.f32 %v356_v10, %v163_v22  ;;  %v135_v26 = vadd.f32 %v353_v9, %v132_v23  ;;  %v172_v41 = vmul.f32 0.2, %v170_v28 }
  0xcd   :  { %v171_v29 = vadd.f32 %v169_v20, %v166_v25  ;;  %v140_v30 = vadd.f32 %v138_v21, %v135_v26  ;;  %v143_v35 = vmax.f32 %v139_v19, %v141_v24  ;;  %v174_v56 = vmax.f32 %v170_v28, %v172_v41  ;;  %v405_v26 = vld [vmem:[#allocation8] sm:$0xff]  }
  0xce   :  { %377 = vmatpush3.bf16.msra.mxu0 %v405_v26 }
  0xcf   :  { %v173_v36 = vmul.f32 0.2, %v171_v29  ;;  %v142_v37 = vmul.f32 0.2, %v140_v30  ;;  %v194_v38 = vpop.permute.xlu1 %193  ;;  %v190_v39 = vpop.permute.xlu0 %189  ;;  %v146_v52 = vmul.f32 %v145_v34, %v143_v35  ;;  %v177_v9 = vmul.f32 %v176_v61, %v174_v56 }
  0xd0   :  { %v197_v42 = vadd.f32 %v359_v31, %v194_v38  ;;  %v196_v43 = vadd.f32 %v359_v31, %v190_v39 }
  0xd1   :  { %v144_v45 = vmax.f32 %v140_v30, %v142_v37  ;;  %v175_v47 = vmax.f32 %v171_v29, %v173_v36  ;;  %v148_v8 = vadd.f32 %v372_v51, %v146_v52 }
  0xd2   :  { %v202_v48 = vadd.f32 %v200_v32, %v197_v42  ;;  %v201_v49 = vadd.f32 %v199_v33, %v196_v43  ;;  %v365_v43 = vld [vmem:[%s668_s7] ss:$0 sm:$0xff] }
  0xd3   :  { %v147_v53 = vmul.f32 %v145_v34, %v144_v45  ;;  %v178_v1 = vmul.f32 %v176_v61, %v175_v47  ;;  %v179_v17 = vadd.f32 %v177_v9, %v148_v8 }
  0xd4   :  { %v204_v57 = vmul.f32 0.2, %v202_v48  ;;  %v203_v58 = vmul.f32 0.2, %v201_v49  ;;  %v221_v59 = vpop.permute.xlu1 %220  ;;  %v225_v60 = vpop.permute.xlu0 %224 }
  0xd5   :  { %v227_v62 = vadd.f32 %v362_v50, %v221_v59  ;;  %v228_v63 = vadd.f32 %v362_v50, %v225_v60  ;;  %v149_v0 = vadd.f32 %v373_v46, %v147_v53 }
  0xd6   :  { %v206_v2 = vmax.f32 %v202_v48, %v204_v57  ;;  %v205_v3 = vmax.f32 %v201_v49, %v203_v58 }
  0xd7   :  { %v232_v5 = vadd.f32 %v230_v54, %v227_v62  ;;  %v233_v6 = vadd.f32 %v231_v55, %v228_v63  ;;  %v180_v7 = vadd.f32 %v178_v1, %v149_v0 }
  0xd8   :  { %v209_v12 = vmul.f32 %v207_v4, %v206_v2  ;;  %v208_v13 = vmul.f32 %v207_v4, %v205_v3 }
  0xd9   :  { %v234_v10 = vmul.f32 0.2, %v232_v5  ;;  %v235_v11 = vmul.f32 0.2, %v233_v6 }
  0xda   :  { %v211_v18 = vadd.f32 %v209_v12, %v180_v7  ;;  %v210_v20 = vadd.f32 %v208_v13, %v179_v17 }
  0xdb   :  { %v236_v15 = vmax.f32 %v232_v5, %v234_v10  ;;  %v237_v16 = vmax.f32 %v233_v6, %v235_v11 }
  0xdd   :  { %v240_v19 = vmul.f32 %v238_v14, %v237_v16  ;;  %v239_v21 = vmul.f32 %v238_v14, %v236_v15 }
  0xdf   :  { %v242_v22 = vadd.f32 %v240_v19, %v211_v18  ;;  %v241_v23 = vadd.f32 %v239_v21, %v210_v20 }
  0xe1   :  { %v247_v24 = vsel %vm243_vm0, %v242_v22, -inf  ;;  %v244_v25 = vsel %vm243_vm0, %v241_v23, -inf }
  0xe2   :  { %248 = vmax.xlane.f32.xlu0 %v247_v24  ;;  %245 = vmax.xlane.f32.xlu1 %v244_v25 }
 0x16b   :  { %v249_v28 = vpop.xlane.xlu0 %248  ;;  %v246_v29 = vpop.xlane.xlu1 %245 }
 0x16c   :  { %v251_v30 = vsub.f32 %v242_v22, %v249_v28  ;;  %v250_v31 = vsub.f32 %v241_v23, %v246_v29 }
 0x16e   :  { %v254_v32 = vmul.f32 1.442695, %v251_v30  ;;  %v252_v33 = vmul.f32 1.442695, %v250_v31 }
 0x170   :  { %406 = vpow2.f32 %v254_v32 }
 0x171   :  { %408 = vpow2.f32 %v252_v33 }
 0x17d   :  { %v407_v34 = vpop.eup %406 }
 0x17e   :  { %v409_v35 = vpop.eup %408  ;;  %v259_v36 = vsel %vm243_vm0, %v407_v34, 0.0 }
 0x17f   :  { %260 = vadd.xlane.f32.xlu0 %v259_v36  ;;  %v256_v37 = vsel %vm243_vm0, %v409_v35, 0.0  ;;  %v262_v38 = vpack.c.bf16 %v407_v34, %v409_v35 }
 0x180   :  { %257 = vadd.xlane.f32.xlu1 %v256_v37 }
 0x181   :  { %379 = vmatmul.mubr.msk.bf16.vlgmr.msra.gmra.mxu0 %vm243_vm0, %v262_v38 }
 0x208   :  { %v261_v40 = vpop.xlane.xlu0 %260 }
 0x209   :  { %v258_v39 = vpop.xlane.xlu1 %257 }
 0x20a   :  { %410 = vrcp.f32 %v258_v39 }
 0x20b   :  { %412 = vrcp.f32 %v261_v40 }
 0x217   :  { %v411_v41 = vpop.eup %410 }
 0x218   :  { %v413_v47 = vpop.eup %412 }
 0x241   :  { %v308_v42 = vpop.f32.mrf.mxu0 }
 0x242   :  { %v317_v44 = vmul.f32 %v411_v41, %v308_v42 }
 0x243   :  { %v380_v45 = vpop.f32.mrf.mxu0 }
 0x244   :  { %v326_v46 = vadd.f32 %v365_v43, %v317_v44 }
 0x245   :  { %v311_v48 = vpop.f32.mrf.mxu0 }
 0x246   :  { %v318_v49 = vmul.f32 %v413_v47, %v311_v48  ;;  %v328_v50 = vmax.f32 %v326_v46, 0.0 }
 0x247   :  { %v381_v51 = vpop.f32.mrf.mxu0 }
 0x248   :  { %v327_v52 = vadd.f32 %v365_v43, %v318_v49  ;;  %330 = vst [vmem:[#allocation14] sm:$0xff] %v328_v50 }
 0x24a   :  { %v329_v53 = vmax.f32 %v327_v52, 0.0 }
 0x24c   :  { %331 = vst [vmem:[#allocation14 + $0x8] sm:$0xff] %v329_v53 }
 0x24d   :  { %525 = shalt.err (!%p522_p1)
}
 0x24e   :  { %343 = dma.vmem_to_hbm [thread:$0]  %s338_s0, 256, %s669_s8, [#allocation4], %s553_s25, %s553_s25, %s554_s26  }
 0x24f   :  { %544 = dma.done.wait [#allocation4], 256  }
 0x250   :  { %545 = vsyncadd [#allocation4], 4294967040 }
 0x251   :  { %347 = vsyncpa [#allocation3], 1 }
 0x252   :  { %348 = vsyncpa [#allocation10], 1 }
 0x253   :  { %349 = vsyncpa [#allocation13], 1 }
 0x254   :  { %350 = vsyncpa [#allocation4], 1 }
 0x255   :  { %351 = vsyncpa [#allocation5], 1 }
 0x256   :  { %352 = vsyncpa [#allocation6], 1 }

// kernel: tpu_custom_call.1
= control target key start
LH: loop header
LB: loop body
LE: loop exit
PB: predicated region body
PF: predicated region fallthrough
CT: control target
= control target key end

     0   :  { %13 = vsyncpa [#allocation5], 0  ;;  %s661_s0 = inlined_call_operand.hbm [shape: f32[4], index: 0, kind: input, shape index: {}]   ;;  %s662_s1 = inlined_call_operand.vmem [shape: f32[4], index: 1, kind: input, shape index: {}]   ;;  %s663_s2 = inlined_call_operand.hbm [shape: bf16[16,128], index: 2, kind: input, shape index: {}]   ;;  %s664_s3 = inlined_call_operand.hbm [shape: f32[4,16], index: 3, kind: input, shape index: {}]   ;;  %s665_s4 = inlined_call_operand.hbm [shape: f32[16,128], index: 4, kind: input, shape index: {}]   ;;  %s666_s5 = inlined_call_operand.vmem [shape: bf16[16,16], index: 5, kind: input, shape index: {}]   ;;  %s667_s6 = inlined_call_operand.hbm [shape: bf16[16,16], index: 6, kind: input, shape index: {}]   ;;  %s668_s7 = inlined_call_operand.vmem [shape: f32[1,128], index: 7, kind: input, shape index: {}]   ;;  %s669_s8 = inlined_call_operand.hbm [shape: f32[16,128], index: 8, kind: output, shape index: {}]  }
   0x1   :  { %14 = vsyncpa [#allocation6], 0 }
   0x2   :  { %15 = vsyncpa [#allocation3], 0 }
   0x3   :  { %16 = vsyncpa [#allocation10], 0 }
   0x4   :  { %17 = vsyncpa [#allocation13], 0 }
   0x5   :  { %18 = vsyncpa [#allocation4], 0  ;;  %s546_s27 = smov [#allocation9]   ;;  %s33_s9 = sshll.u32 %s662_s1, 4  ;;  %s34_s9 = int_to_ptr.vmem [resolvable:$true] %s33_s9 }
   0x6   :  { %s55_s28 = sshll.u32 %s546_s27, 4  ;;  %s56_s28 = int_to_ptr.vmem [resolvable:$true] %s55_s28 }
   0x7   :  { %s422_s10 = scalar_lea.vmem %s56_s28, 64  ;;  %p427_p1 = scmp.lt.s32.totalorder %s56_s28, %s56_s28 }
   0x8   :  { %p423_p0 = scmp.ne.s32.totalorder %s56_s28, %s422_s10  ;;  %p428_p2 = scmp.lt.s32.totalorder %s422_s10, %s422_s10 }
   0xa   :  { %p429_p3 = por %p428_p2, %p427_p1 }
   0xc   :  { %p430_p4 = pnand %p429_p3, %p423_p0 }
   0xe   :  { %433 = shalt.err (!%p430_p4)
}
   0xf   :  { %58 = dma.hbm_to_vmem [thread:$0]  %s664_s3, 64, %s56_s28, [#allocation10]  }
  0x10   :  { %s547_s13 = smov [#allocation2]   ;;  %s442_s16 = scalar_lea.vmem %s34_s9, 16 }
  0x11   :  { %26 = dma.hbm_to_smem %s661_s0, 16, %s547_s13, [#allocation5]  }
  0x12   :  { %p443_p5 = scmp.ne.s32.totalorder %s34_s9, %s442_s16  ;;  %p447_p6 = scmp.lt.s32.totalorder %s34_s9, %s34_s9 }
  0x13   :  { %p448_p7 = scmp.lt.s32.totalorder %s442_s16, %s442_s16 }
  0x15   :  { %p449_p8 = por %p448_p7, %p447_p6 }
  0x17   :  { %p450_p9 = pnand %p449_p8, %p443_p5 }
  0x19   :  { %453 = shalt.err (!%p450_p9)
}
  0x1a   :  { %s548_s1 = smov [#allocation7]   ;;  %s549_s17 = smov [#allocation8]  }
  0x1b   :  { %36 = dma.vmem_to_smem %s34_s9, 16, %s548_s1, [#allocation6]  }
  0x1c   :  { %s42_s18 = sshll.u32 %s549_s17, 4  ;;  %s43_s18 = int_to_ptr.vmem [resolvable:$true] %s42_s18 }
  0x1d   :  { %s462_s19 = scalar_lea.vmem %s43_s18, 128  ;;  %p467_p11 = scmp.lt.s32.totalorder %s43_s18, %s43_s18 }
  0x1e   :  { %p463_p10 = scmp.ne.s32.totalorder %s43_s18, %s462_s19  ;;  %p468_p12 = scmp.lt.s32.totalorder %s462_s19, %s462_s19 }
  0x20   :  { %p469_p13 = por %p468_p12, %p467_p11 }
  0x22   :  { %p470_p0 = pnand %p469_p13, %p463_p10 }
  0x24   :  { %473 = shalt.err (!%p470_p0)
}
  0x25   :  { %s550_s0 = smov 64   ;;  %s551_s3 = smov 4  }
  0x26   :  { %48 = dma.hbm_to_vmem [thread:$0]  %s663_s2, 128, %s43_s18, [#allocation3], %s550_s0, %s550_s0, %s551_s3  }
  0x27   :  { %s552_s22 = smov [#allocation11]  }
  0x28   :  { %s64_s23 = sshll.u32 %s552_s22, 4  ;;  %s65_s23 = int_to_ptr.vmem [resolvable:$true] %s64_s23 }
  0x29   :  { %s482_s24 = scalar_lea.vmem %s65_s23, 256  ;;  %p487_p2 = scmp.lt.s32.totalorder %s65_s23, %s65_s23 }
  0x2a   :  { %p483_p1 = scmp.ne.s32.totalorder %s65_s23, %s482_s24  ;;  %p488_p3 = scmp.lt.s32.totalorder %s482_s24, %s482_s24 }
  0x2c   :  { %p489_p4 = por %p488_p3, %p487_p2 }
  0x2e   :  { %p490_p5 = pnand %p489_p4, %p483_p1 }
  0x30   :  { %493 = shalt.err (!%p490_p5)
}
  0x31   :  { %s553_s25 = smov 128   ;;  %s554_s26 = smov 8  }
  0x32   :  { %70 = dma.hbm_to_vmem [thread:$0]  %s665_s4, 256, %s65_s23, [#allocation10], %s553_s25, %s553_s25, %s554_s26  }
  0x33   :  { %s555_s2 = smov [#allocation12]  }
  0x34   :  { %s78_s29 = sshll.u32 %s555_s2, 4  ;;  %s79_s29 = int_to_ptr.vmem [resolvable:$true] %s78_s29 }
  0x35   :  { %s502_s30 = scalar_lea.vmem %s79_s29, 128  ;;  %p507_p7 = scmp.lt.s32.totalorder %s79_s29, %s79_s29 }
  0x36   :  { %p503_p6 = scmp.ne.s32.totalorder %s79_s29, %s502_s30  ;;  %p508_p8 = scmp.lt.s32.totalorder %s502_s30, %s502_s30 }
  0x38   :  { %p509_p9 = por %p508_p8, %p507_p7 }
  0x3a   :  { %p510_p10 = pnand %p509_p9, %p503_p6 }
  0x3c   :  { %513 = shalt.err (!%p510_p10)
}
  0x3d   :  { %84 = dma.hbm_to_vmem [thread:$0]  %s667_s6, 128, %s79_s29, [#allocation13], %s550_s0, %s550_s0, %s551_s3  }
  0x3e   :  { %534 = dma.done.wait [#allocation5], 16  }
  0x3f   :  { %535 = vsyncadd [#allocation5], 4294967280 }
  0x40   :  { %536 = dma.done.wait [#allocation6], 16  }
  0x41   :  { %537 = vsyncadd [#allocation6], 4294967280 }
  0x42   :  { %538 = dma.done.wait [#allocation3], 128  }
  0x43   :  { %539 = vsyncadd [#allocation3], 4294967168 }
  0x44   :  { %540 = dma.done.wait [#allocation10], 320  }
  0x45   :  { %541 = vsyncadd [#allocation10], 4294966976 }
  0x46   :  { %542 = dma.done.wait [#allocation13], 128  }
  0x47   :  { %543 = vsyncadd [#allocation13], 4294967168 }
  0x48   :  { %105 = sfence }
  0x49   :  { %v111_v0 = vld [vmem:[#allocation11] sm:$0xff]  ;;  %v556_v1 = vmov 1   ;;  %v557_v2 = vmov 0   ;;  %v112_v3 = vld [vmem:[#allocation11 + $0x8] sm:$0xff]  ;;  %v558_v4 = vmov 2   ;;  %v559_v5 = vmov 3  }
  0x4a   :  { %400 = vset.pattern.permute.xlu1 %v556_v1  ;;  %399 = vset.pattern.permute.xlu0 %v557_v2  ;;  %s117_s4 = sld [smem:[#allocation2]]  ;;  %v367_v6 = vld [vmem:[%s666_s5] sm:$0xff]   ;;  %v353_v9 = vld [vmem:[#allocation9] ss:$0 sm:$0xff]  ;;  %v356_v10 = vld [vmem:[#allocation9 + $0x1] ss:$0 sm:$0xff] }
  0x4b   :  { %158 = vperm.xlu1 %400, %v111_v0   ;;  %126 = vperm.xlu0 %399, %v111_v0   ;;  %s354_s6 = sld [smem:[#allocation2 + $0x1]]  ;;  %v368_v7 = vunpack.c.l.bf16 %v367_v6  ;;  %v369_v13 = vunpack.c.h.bf16 %v367_v6  ;;  %v359_v31 = vld [vmem:[#allocation9 + $0x2] ss:$0 sm:$0xff]  ;;  %v371_v40 = vld [vmem:[#allocation12] sm:$0xff]   ;;  %v362_v50 = vld [vmem:[#allocation9 + $0x3] ss:$0 sm:$0xff] }
  0x4c   :  { %s357_s13 = sld [smem:[#allocation2 + $0x2]]  ;;  %v373_v46 = vunpack.c.h.bf16 %v371_v40  ;;  %v372_v51 = vunpack.c.l.bf16 %v371_v40  ;;  %vm243_vm0 = vcmask 130048   ;;  %vm561_vm1 = vmmov 0   ;;  %s562_s19 = smov [#allocation14]  }
  0x4d   :  { %s632_s14 = sld [smem:[#allocation7]]  ;;  %s337_s0 = sshll.u32 %s562_s19, 4  ;;  %s338_s0 = int_to_ptr.vmem [resolvable:$true] %s337_s0 }
  0x4e   :  { %s634_s15 = sld [smem:[#allocation2 + $0x3]]  ;;  %s514_s3 = scalar_lea.vmem %s338_s0, 256 }
  0x4f   :  { %162 = vperm.xlu1 %400, %v112_v3   ;;  %131 = vperm.xlu0 %399, %v112_v3   ;;  %s636_s5 = sld [smem:[#allocation7 + $0x1]]  ;;  %p515_p11 = scmp.ne.s32.totalorder %s338_s0, %s514_s3 }
  0x50   :  { %v136_v8 = vstv %s117_s4  ;;  %s638_s16 = sld [smem:[#allocation7 + $0x2]]  ;;  %p519_p12 = scmp.lt.s32.totalorder %s338_s0, %s338_s0 }
  0x51   :  { %v167_v11 = vstv %s354_s6  ;;  %v137_v12 = vmul.f32 %v368_v7, %v136_v8  ;;  %v138_v21 = vmul.f32 %v369_v13, %v136_v8  ;;  %s642_s1 = sld [smem:[#allocation7 + $0x3]]  ;;  %p520_p13 = scmp.lt.s32.totalorder %s514_s3, %s514_s3 }
  0x52   :  { %v168_v18 = vmul.f32 %v368_v7, %v167_v11  ;;  %v169_v20 = vmul.f32 %v369_v13, %v167_v11  ;;  %v198_v27 = vstv %s357_s13 }
  0x53   :  { %402 = vset.pattern.permute.xlu1 %v558_v4  ;;  %401 = vset.pattern.permute.xlu0 %v558_v4  ;;  %v200_v32 = vmul.f32 %v369_v13, %v198_v27  ;;  %v199_v33 = vmul.f32 %v368_v7, %v198_v27  ;;  %v145_v34 = vstv %s632_s14  ;;  %v560_v27 = vmov 0.0   ;;  %p521_p0 = por %p520_p13, %p519_p12 }
  0x54   :  { %193 = vperm.xlu1 %402, %v112_v3   ;;  %189 = vperm.xlu0 %401, %v111_v0   ;;  %v229_v44 = vstv %s634_s15 }
  0x55   :  { %v230_v54 = vmul.f32 %v368_v7, %v229_v44  ;;  %v231_v55 = vmul.f32 %v369_v13, %v229_v44  ;;  %v176_v61 = vstv %s636_s5  ;;  %376 = vmatprep.subr.bf16.mxu0 %v560_v27  ;;  %378 = vmatprep.mubr.msk.bf16.mxu0 %vm561_vm1, %v560_v27  ;;  %p522_p1 = pnand %p521_p0, %p515_p11 }
  0x56   :  { %v207_v4 = vstv %s638_s16 }
  0x58   :  { %403 = vset.pattern.permute.xlu1 %v559_v5  ;;  %404 = vset.pattern.permute.xlu0 %v559_v5 }
  0x59   :  { %220 = vperm.xlu1 %403, %v111_v0   ;;  %224 = vperm.xlu0 %404, %v112_v3  }
  0xc6   :  { %v159_v14 = vpop.permute.xlu1 %158  ;;  %v127_v15 = vpop.permute.xlu0 %126 }
  0xc7   :  { %v134_v16 = vadd.f32 %v353_v9, %v127_v15  ;;  %v165_v17 = vadd.f32 %v356_v10, %v159_v14  ;;  %v238_v14 = vstv %s642_s1 }
  0xc9   :  { %v139_v19 = vadd.f32 %v137_v12, %v134_v16  ;;  %v170_v28 = vadd.f32 %v168_v18, %v165_v17 }
  0xca   :  { %v163_v22 = vpop.permute.xlu1 %162  ;;  %v132_v23 = vpop.permute.xlu0 %131 }
  0xcb   :  { %v141_v24 = vmul.f32 0.2, %v139_v19  ;;  %v166_v25 = vadd.f32 %v356_v10, %v163_v22  ;;  %v135_v26 = vadd.f32 %v353_v9, %v132_v23  ;;  %v172_v41 = vmul.f32 0.2, %v170_v28 }
  0xcd   :  { %v171_v29 = vadd.f32 %v169_v20, %v166_v25  ;;  %v140_v30 = vadd.f32 %v138_v21, %v135_v26  ;;  %v143_v35 = vmax.f32 %v139_v19, %v141_v24  ;;  %v174_v56 = vmax.f32 %v170_v28, %v172_v41  ;;  %v405_v26 = vld [vmem:[#allocation8] sm:$0xff]  }
  0xce   :  { %377 = vmatpush3.bf16.msra.mxu0 %v405_v26 }
  0xcf   :  { %v173_v36 = vmul.f32 0.2, %v171_v29  ;;  %v142_v37 = vmul.f32 0.2, %v140_v30  ;;  %v194_v38 = vpop.permute.xlu1 %193  ;;  %v190_v39 = vpop.permute.xlu0 %189  ;;  %v146_v52 = vmul.f32 %v145_v34, %v143_v35  ;;  %v177_v9 = vmul.f32 %v176_v61, %v174_v56 }
  0xd0   :  { %v197_v42 = vadd.f32 %v359_v31, %v194_v38  ;;  %v196_v43 = vadd.f32 %v359_v31, %v190_v39 }
  0xd1   :  { %v144_v45 = vmax.f32 %v140_v30, %v142_v37  ;;  %v175_v47 = vmax.f32 %v171_v29, %v173_v36  ;;  %v148_v8 = vadd.f32 %v372_v51, %v146_v52 }
  0xd2   :  { %v202_v48 = vadd.f32 %v200_v32, %v197_v42  ;;  %v201_v49 = vadd.f32 %v199_v33, %v196_v43  ;;  %v365_v43 = vld [vmem:[%s668_s7] ss:$0 sm:$0xff] }
  0xd3   :  { %v147_v53 = vmul.f32 %v145_v34, %v144_v45  ;;  %v178_v1 = vmul.f32 %v176_v61, %v175_v47  ;;  %v179_v17 = vadd.f32 %v177_v9, %v148_v8 }
  0xd4   :  { %v204_v57 = vmul.f32 0.2, %v202_v48  ;;  %v203_v58 = vmul.f32 0.2, %v201_v49  ;;  %v221_v59 = vpop.permute.xlu1 %220  ;;  %v225_v60 = vpop.permute.xlu0 %224 }
  0xd5   :  { %v227_v62 = vadd.f32 %v362_v50, %v221_v59  ;;  %v228_v63 = vadd.f32 %v362_v50, %v225_v60  ;;  %v149_v0 = vadd.f32 %v373_v46, %v147_v53 }
  0xd6   :  { %v206_v2 = vmax.f32 %v202_v48, %v204_v57  ;;  %v205_v3 = vmax.f32 %v201_v49, %v203_v58 }
  0xd7   :  { %v232_v5 = vadd.f32 %v230_v54, %v227_v62  ;;  %v233_v6 = vadd.f32 %v231_v55, %v228_v63  ;;  %v180_v7 = vadd.f32 %v178_v1, %v149_v0 }
  0xd8   :  { %v209_v12 = vmul.f32 %v207_v4, %v206_v2  ;;  %v208_v13 = vmul.f32 %v207_v4, %v205_v3 }
  0xd9   :  { %v234_v10 = vmul.f32 0.2, %v232_v5  ;;  %v235_v11 = vmul.f32 0.2, %v233_v6 }
  0xda   :  { %v211_v18 = vadd.f32 %v209_v12, %v180_v7  ;;  %v210_v20 = vadd.f32 %v208_v13, %v179_v17 }
  0xdb   :  { %v236_v15 = vmax.f32 %v232_v5, %v234_v10  ;;  %v237_v16 = vmax.f32 %v233_v6, %v235_v11 }
  0xdd   :  { %v240_v19 = vmul.f32 %v238_v14, %v237_v16  ;;  %v239_v21 = vmul.f32 %v238_v14, %v236_v15 }
  0xdf   :  { %v242_v22 = vadd.f32 %v240_v19, %v211_v18  ;;  %v241_v23 = vadd.f32 %v239_v21, %v210_v20 }
  0xe1   :  { %v247_v24 = vsel %vm243_vm0, %v242_v22, -inf  ;;  %v244_v25 = vsel %vm243_vm0, %v241_v23, -inf }
  0xe2   :  { %248 = vmax.xlane.f32.xlu0 %v247_v24  ;;  %245 = vmax.xlane.f32.xlu1 %v244_v25 }
 0x16b   :  { %v249_v28 = vpop.xlane.xlu0 %248  ;;  %v246_v29 = vpop.xlane.xlu1 %245 }
 0x16c   :  { %v251_v30 = vsub.f32 %v242_v22, %v249_v28  ;;  %v250_v31 = vsub.f32 %v241_v23, %v246_v29 }
 0x16e   :  { %v254_v32 = vmul.f32 1.442695, %v251_v30  ;;  %v252_v33 = vmul.f32 1.442695, %v250_v31 }
 0x170   :  { %406 = vpow2.f32 %v254_v32 }
 0x171   :  { %408 = vpow2.f32 %v252_v33 }
 0x17d   :  { %v407_v34 = vpop.eup %406 }
 0x17e   :  { %v409_v35 = vpop.eup %408  ;;  %v259_v36 = vsel %vm243_vm0, %v407_v34, 0.0 }
 0x17f   :  { %260 = vadd.xlane.f32.xlu0 %v259_v36  ;;  %v256_v37 = vsel %vm243_vm0, %v409_v35, 0.0  ;;  %v262_v38 = vpack.c.bf16 %v407_v34, %v409_v35 }
 0x180   :  { %257 = vadd.xlane.f32.xlu1 %v256_v37 }
 0x181   :  { %379 = vmatmul.mubr.msk.bf16.vlgmr.msra.gmra.mxu0 %vm243_vm0, %v262_v38 }
 0x208   :  { %v261_v40 = vpop.xlane.xlu0 %260 }
 0x209   :  { %v258_v39 = vpop.xlane.xlu1 %257 }
 0x20a   :  { %410 = vrcp.f32 %v258_v39 }
 0x20b   :  { %412 = vrcp.f32 %v261_v40 }
 0x217   :  { %v411_v41 = vpop.eup %410 }
 0x218   :  { %v413_v47 = vpop.eup %412 }
 0x241   :  { %v308_v42 = vpop.f32.mrf.mxu0 }
 0x242   :  { %v317_v44 = vmul.f32 %v411_v41, %v308_v42 }
 0x243   :  { %v380_v45 = vpop.f32.mrf.mxu0 }
 0x244   :  { %v326_v46 = vadd.f32 %v365_v43, %v317_v44 }
 0x245   :  { %v311_v48 = vpop.f32.mrf.mxu0 }
 0x246   :  { %v318_v49 = vmul.f32 %v413_v47, %v311_v48  ;;  %v328_v50 = vmax.f32 %v326_v46, 0.0 }
 0x247   :  { %v381_v51 = vpop.f32.mrf.mxu0 }
 0x248   :  { %v327_v52 = vadd.f32 %v365_v43, %v318_v49  ;;  %330 = vst [vmem:[#allocation14] sm:$0xff] %v328_v50 }
 0x24a   :  { %v329_v53 = vmax.f32 %v327_v52, 0.0 }
 0x24c   :  { %331 = vst [vmem:[#allocation14 + $0x8] sm:$0xff] %v329_v53 }
 0x24d   :  { %525 = shalt.err (!%p522_p1)
}
 0x24e   :  { %343 = dma.vmem_to_hbm [thread:$0]  %s338_s0, 256, %s669_s8, [#allocation4], %s553_s25, %s553_s25, %s554_s26  }
 0x24f   :  { %544 = dma.done.wait [#allocation4], 256  }
 0x250   :  { %545 = vsyncadd [#allocation4], 4294967040 }
 0x251   :  { %347 = vsyncpa [#allocation3], 1 }
 0x252   :  { %348 = vsyncpa [#allocation10], 1 }
 0x253   :  { %349 = vsyncpa [#allocation13], 1 }
 0x254   :  { %350 = vsyncpa [#allocation4], 1 }
 0x255   :  { %351 = vsyncpa [#allocation5], 1 }
 0x256   :  { %352 = vsyncpa [#allocation6], 1 }

</bundles_post_ra>
